<compile_context>
chip_gen: v5e
topology: v5e:2x2
jax: 0.10.0
libtpu: 0.0.40
codegen_flags: <defaults>
</compile_context>

<pallas_src>
import functools
import math

import jax
import jax.numpy as jnp
from jax.experimental import pallas as pl
from jax.experimental.pallas import tpu as pltpu


# ----------------------------------------------------------------------------
# Tiling helpers
# ----------------------------------------------------------------------------
def _sublane(dtype) -> int:
    """Minimum sublane tile for a dtype (8 for f32, 16 for bf16, 32 for i8)."""
    return max(8, 32 // jnp.dtype(dtype).itemsize)


def _tile(full: int, target: int, min_align: int) -> int:
    """Largest legal tile <= target for one block dim.

    Prefers 128-aligned tiles (lane density), falls back to the minimum legal
    alignment, then to the full extent (always legal per the BlockSpec rule).
    """
    if full <= target:
        return full
    tries = [128, min_align] if min_align < 128 else [min_align]
    for align in tries:
        t = (target // align) * align
        while t >= align:
            if full % t == 0:
                return t
            t -= align
    # TODO(synk): pad + mask instead of a whole-dim block for extents with no
    # tileable divisor (a whole-dim block can blow VMEM for very large dims).
    return full


def _vmem_limit(need_bytes: int):
    """Explicit scoped-VMEM limit when the footprint exceeds the smallest
    per-generation default (16 MiB on v5e); capped below v7x's 64 MiB."""
    if need_bytes <= 12 << 20:
        return None
    return int(min(need_bytes + (4 << 20), 48 << 20))


def _compiler_params(dim_sem, need_bytes):
    kwargs = dict(dimension_semantics=dim_sem)
    lim = _vmem_limit(need_bytes)
    if lim is not None:
        kwargs["vmem_limit_bytes"] = lim
    return pltpu.CompilerParams(**kwargs)


# ----------------------------------------------------------------------------
# Linear (matmul + bias) kernel: y = x @ w + b
# ----------------------------------------------------------------------------
def _linear_kernel(x_ref, w_ref, b_ref, o_ref, acc_ref):
    k = pl.program_id(2)

    @pl.when(k == 0)
    def _():
        acc_ref[...] = jnp.zeros_like(acc_ref)

    acc_ref[...] += jnp.dot(
        x_ref[...], w_ref[...], preferred_element_type=jnp.float32
    )

    @pl.when(k == pl.num_programs(2) - 1)
    def _():
        o_ref[...] = (acc_ref[...] + b_ref[...].astype(jnp.float32)).astype(o_ref.dtype)


def linear(x2d: jnp.ndarray, w: jnp.ndarray, b: jnp.ndarray,
           *, tm: int = 512, tn: int = 256, tk: int = 512) -> jnp.ndarray:
    """x2d: (M, K); w: (K, N); b: (N,). Returns (M, N) = x2d @ w + b."""
    M, K = x2d.shape
    K2, N = w.shape
    assert K == K2 and b.shape == (N,)

    tm = _tile(M, tm, _sublane(x2d.dtype))   # sublane dim
    tn = _tile(N, tn, 128)                   # lane dim
    tk = _tile(K, tk, 128)                   # lane dim of x (and sublane of w)
    grid = (M // tm, N // tn, K // tk)

    itm = x2d.dtype.itemsize
    need = 2 * (tm * tk + tk * tn + tm * tn) * itm + tm * tn * 4 + 2 * tn * itm

    return pl.pallas_call(
        _linear_kernel,
        out_shape=jax.ShapeDtypeStruct((M, N), x2d.dtype),
        grid_spec=pltpu.PrefetchScalarGridSpec(
            num_scalar_prefetch=0,
            grid=grid,
            in_specs=[
                pl.BlockSpec((tm, tk), lambda i, j, k: (i, k)),
                pl.BlockSpec((tk, tn), lambda i, j, k: (k, j)),
                pl.BlockSpec((1, tn), lambda i, j, k: (0, j)),
            ],
            out_specs=pl.BlockSpec((tm, tn), lambda i, j, k: (i, j)),
            scratch_shapes=[pltpu.VMEM((tm, tn), jnp.float32)],
        ),
        compiler_params=_compiler_params(("parallel", "parallel", "arbitrary"), need),
    )(x2d, w, b.reshape(1, N))


# ----------------------------------------------------------------------------
# Flash-attention over the packed QKV slab.
#   qkv: (B, S, 3D) with per-token column layout [head0:(q|k|v), head1:(q|k|v), ...]
#   (exactly the PyTorch `view(B, S, H, 3*hd)` convention).  q columns are
#   assumed pre-scaled by 1/sqrt(head_dim).  Output: (B, S, D), head h in
#   columns [h*hd, (h+1)*hd)  (== the PyTorch merge-heads layout).
# ----------------------------------------------------------------------------
def _attn_kernel(q_ref, kv_ref, o_ref, m_sc, l_sc, acc_sc, *, heads, head_dim):
    ki = pl.program_id(2)
    hd = head_dim

    @pl.when(ki == 0)
    def _():
        m_sc[...] = jnp.full_like(m_sc, -jnp.inf)
        l_sc[...] = jnp.zeros_like(l_sc)
        acc_sc[...] = jnp.zeros_like(acc_sc)

    # Unrolled (static) loop over heads: all heads share this grid step, so the
    # KV DMA and per-step overhead are amortised and the output stays D-wide.
    for h in range(heads):
        base = h * 3 * hd
        q_h = q_ref[:, base:base + hd]                  # (tq, hd), pre-scaled
        k_h = kv_ref[:, base + hd:base + 2 * hd]        # (tkv, hd)
        v_h = kv_ref[:, base + 2 * hd:base + 3 * hd]    # (tkv, hd)

        s = jax.lax.dot_general(                        # (tq, tkv) = q_h @ k_h^T
            q_h, k_h, (((1,), (1,)), ((), ())),
            preferred_element_type=jnp.float32)

        m_prev = m_sc[h]                                # (tq, 1)
        m_new = jnp.maximum(m_prev, jnp.max(s, axis=-1, keepdims=True))
        alpha = jnp.exp(m_prev - m_new)
        p = jnp.exp(s - m_new)

        l_sc[h] = alpha * l_sc[h] + jnp.sum(p, axis=-1, keepdims=True)
        acc_sc[h] = alpha * acc_sc[h] + jax.lax.dot_general(
            p.astype(v_h.dtype), v_h, (((1,), (0,)), ((), ())),
            preferred_element_type=jnp.float32)
        m_sc[h] = m_new

    @pl.when(ki == pl.num_programs(2) - 1)
    def _():
        outs = []
        for h in range(heads):
            inv_l = pl.reciprocal(l_sc[h], approx=True)          # (tq, 1), EUP
            outs.append(acc_sc[h] * inv_l)                       # (tq, hd)
        # Single lane-dense (tq, D) store.
        o_ref[...] = jnp.concatenate(outs, axis=-1).astype(o_ref.dtype)


def flash_attention_packed(qkv: jnp.ndarray, heads: int,
                           *, tq: int = 512, tkv: int = 512) -> jnp.ndarray:
    B, S, D3 = qkv.shape
    assert D3 % 3 == 0
    D = D3 // 3
    assert D % heads == 0
    hd = D // heads

    sub = _sublane(qkv.dtype)
    tq = _tile(S, tq, sub)     # query rows per step
    tkv = _tile(S, tkv, sub)   # kv rows per step (128-aligned when possible)
    grid = (B, S // tq, S // tkv)

    itm = qkv.dtype.itemsize
    hd_pad = -(-hd // 128) * 128
    need = (2 * (tq * D3 + tkv * D3 + tq * D) * itm        # double-buffered I/O
            + heads * tq * hd_pad * 4                       # acc scratch (padded)
            + 2 * heads * tq * 128 * 4)                     # m / l scratch (padded)

    kernel = functools.partial(_attn_kernel, heads=heads, head_dim=hd)

    return pl.pallas_call(
        kernel,
        out_shape=jax.ShapeDtypeStruct((B, S, D), qkv.dtype),
        grid_spec=pltpu.PrefetchScalarGridSpec(
            num_scalar_prefetch=0,
            grid=grid,
            in_specs=[
                # Query-row view of the packed slab; block index is constant
                # across the kv axis, so it is fetched once per (b, qi).
                pl.BlockSpec((None, tq, D3), lambda b, qi, ki: (b, qi, 0)),
                # Key/value-row view of the packed slab (streamed over ki).
                pl.BlockSpec((None, tkv, D3), lambda b, qi, ki: (b, ki, 0)),
            ],
            out_specs=pl.BlockSpec((None, tq, D), lambda b, qi, ki: (b, qi, 0)),
            scratch_shapes=[
                pltpu.VMEM((heads, tq, 1), jnp.float32),    # running max
                pltpu.VMEM((heads, tq, 1), jnp.float32),    # running denom
                pltpu.VMEM((heads, tq, hd), jnp.float32),   # output accumulator
            ],
        ),
        compiler_params=_compiler_params(("parallel", "parallel", "arbitrary"), need),
    )(qkv, qkv)


# ----------------------------------------------------------------------------
# Full Attention-module forward.
# ----------------------------------------------------------------------------
def attention_forward(x: jnp.ndarray, params: dict, heads: int) -> jnp.ndarray:
    B, S, D = x.shape
    assert D % heads == 0
    hd = D // heads

    # Fold the 1/sqrt(head_dim) softmax scale into the q columns of the QKV
    # projection (weight-sized op; removes the scale from the attention loop).
    # Column layout follows the PyTorch module: per head h the 3*hd columns are
    # [q(hd) | k(hd) | v(hd)], so "q column" <=> (col % (3*hd)) < hd.
    col = jnp.arange(3 * D) % (3 * hd)
    scale_vec = jnp.where(col < hd, 1.0 / math.sqrt(hd), 1.0).astype(params["w_qkv"].dtype)
    w_qkv = params["w_qkv"] * scale_vec[None, :]
    b_qkv = params["b_qkv"] * scale_vec

    # QKV projection on a lane-dense (B*S, 3D) slab.
    qkv = linear(x.reshape(B * S, D), w_qkv, b_qkv)              # (B*S, 3D)

    # Flash attention straight off the packed slab: no q/k/v materialisation,
    # no head transposes; output comes back as a lane-dense (B, S, D) slab.
    vals = flash_attention_packed(qkv.reshape(B, S, 3 * D), heads)

    # Output projection.
    out = linear(vals.reshape(B * S, D), params["w_out"], params["b_out"])
    return out.reshape(B, S, D)


# ----------------------------------------------------------------------------
# Pure-JAX reference (mirrors the PyTorch forward; mask path is unused there).
# ----------------------------------------------------------------------------
def attention_reference(x: jnp.ndarray, params: dict, heads: int) -> jnp.ndarray:
    B, S, D = x.shape
    hd = D // heads
    hp = jax.lax.Precision.HIGHEST
    qkv = jnp.einsum("bsd,de->bse", x, params["w_qkv"], precision=hp) + params["b_qkv"]
    qkv = qkv.reshape(B, S, heads, 3 * hd).transpose(0, 2, 1, 3)
    q, k, v = qkv[..., :hd], qkv[..., hd:2 * hd], qkv[..., 2 * hd:]
    logits = jnp.einsum("bhqd,bhkd->bhqk", q, k, precision=hp) / math.sqrt(hd)
    attn = jax.nn.softmax(logits, axis=-1)
    vals = jnp.einsum("bhqk,bhkd->bhqd", attn, v, precision=hp)
    vals = vals.transpose(0, 2, 1, 3).reshape(B, S, D)
    return jnp.einsum("bsd,de->bse", vals, params["w_out"], precision=hp) + params["b_out"]


if __name__ == "__main__":
    B, S, D, H = 2, 8, 32, 4   # batch=2, seq=8, hidden=32, heads=4 (head_dim=8)

    key = jax.random.PRNGKey(0)
    kx, kw1, kb1, kw2, kb2 = jax.random.split(key, 5)

    x = jax.random.normal(kx, (B, S, D), dtype=jnp.float32)
    params = {
        "w_qkv": jax.random.normal(kw1, (D, 3 * D), dtype=jnp.float32) / math.sqrt(D),
        "b_qkv": jax.random.normal(kb1, (3 * D,), dtype=jnp.float32) * 0.02,
        "w_out": jax.random.normal(kw2, (D, D), dtype=jnp.float32) / math.sqrt(D),
        "b_out": jax.random.normal(kb2, (D,), dtype=jnp.float32) * 0.02,
    }

    out = attention_forward(x, params, heads=H)
    out = jax.block_until_ready(out)

    ref = attention_reference(x, params, heads=H)
    assert out.shape == (B, S, D)
    max_err = float(jnp.max(jnp.abs(out - ref)))
    # Slightly looser than exact-divide tolerance: final normalisation uses the
    # EUP approximate reciprocal (applied once per output tile).
    assert jnp.allclose(out, ref, atol=3e-3, rtol=3e-3), f"max_err={max_err}"

    print("KERNEL_OK")
</pallas_src>

<mosaic_0001>
module attributes {stable_mosaic.version = 11 : i64} {
  func.func @_linear_kernel(%arg0: i32, %arg1: i32, %arg2: i32, %arg3: memref<16x32xf32, #tpu.memory_space<vmem>>, %arg4: memref<32x96xf32, #tpu.memory_space<vmem>>, %arg5: memref<1x96xf32, #tpu.memory_space<vmem>>, %arg6: memref<16x96xf32, #tpu.memory_space<vmem>>, %arg7: memref<16x96xf32, #tpu.memory_space<vmem>>) attributes {dimension_semantics = [#tpu.dimension_semantics<parallel>, #tpu.dimension_semantics<parallel>, #tpu.dimension_semantics<arbitrary>], iteration_bounds = array<i64: 1, 1, 1>, scalar_prefetch = 0 : i64, scratch_operands = 1 : i64, tpu.core_type = #tpu.core_type<tc>, window_params = [{transform_indices = @transform_0, window_bounds = array<i64: 16, 32>}, {transform_indices = @transform_1, window_bounds = array<i64: 32, 96>}, {transform_indices = @transform_2, window_bounds = array<i64: 1, 96>}, {transform_indices = @transform_3, window_bounds = array<i64: 16, 96>}]} {
    %c0_i32 = arith.constant 0 : i32
    %0 = arith.cmpi eq, %arg2, %c0_i32 : i32
    %1 = arith.extui %0 : i1 to i32
    %c0_i32_0 = arith.constant 0 : i32
    %2 = arith.cmpi ne, %1, %c0_i32_0 : i32
    scf.if %2 {
      %cst_10 = arith.constant 0.000000e+00 : f32
      %12 = vector.broadcast %cst_10 : f32 to vector<16x96xf32>
      %c0_11 = arith.constant 0 : index
      %c0_12 = arith.constant 0 : index
      %13 = vector.load %arg7[%c0_11, %c0_12] : memref<16x96xf32, #tpu.memory_space<vmem>>, vector<16x96xf32>
      tpu.vector_store %arg7[%c0_11, %c0_12], %12 {strides = array<i32>} : memref<16x96xf32, #tpu.memory_space<vmem>>, vector<16x96xf32>,
    } else {
    }
    %c0 = arith.constant 0 : index
    %c0_1 = arith.constant 0 : index
    %3 = vector.load %arg7[%c0, %c0_1] : memref<16x96xf32, #tpu.memory_space<vmem>>, vector<16x96xf32>
    %c0_2 = arith.constant 0 : index
    %c0_3 = arith.constant 0 : index
    %4 = vector.load %arg3[%c0_2, %c0_3] : memref<16x32xf32, #tpu.memory_space<vmem>>, vector<16x32xf32>
    %c0_4 = arith.constant 0 : index
    %c0_5 = arith.constant 0 : index
    %5 = vector.load %arg4[%c0_4, %c0_5] : memref<32x96xf32, #tpu.memory_space<vmem>>, vector<32x96xf32>
    %cst = arith.constant dense<0.000000e+00> : vector<16x96xf32>
    %6 = tpu.matmul %4, %5, %cst {dimension_numbers = #tpu.dot_dimension_numbers<[1], [0], [0], [1], [0, 0, 1, 1], [], []>} : vector<16x32xf32>, vector<32x96xf32>, vector<16x96xf32> -> vector<16x96xf32>
    %7 = arith.addf %3, %6 : vector<16x96xf32>
    %c0_6 = arith.constant 0 : index
    %c0_7 = arith.constant 0 : index
    %8 = vector.load %arg7[%c0_6, %c0_7] : memref<16x96xf32, #tpu.memory_space<vmem>>, vector<16x96xf32>
    tpu.vector_store %arg7[%c0_6, %c0_7], %7 {strides = array<i32>} : memref<16x96xf32, #tpu.memory_space<vmem>>, vector<16x96xf32>,
    %c0_i32_8 = arith.constant 0 : i32
    %9 = arith.cmpi eq, %arg2, %c0_i32_8 : i32
    %10 = arith.extui %9 : i1 to i32
    %c0_i32_9 = arith.constant 0 : i32
    %11 = arith.cmpi ne, %10, %c0_i32_9 : i32
    scf.if %11 {
      %c0_10 = arith.constant 0 : index
      %c0_11 = arith.constant 0 : index
      %12 = vector.load %arg7[%c0_10, %c0_11] : memref<16x96xf32, #tpu.memory_space<vmem>>, vector<16x96xf32>
      %c0_12 = arith.constant 0 : index
      %c0_13 = arith.constant 0 : index
      %13 = vector.load %arg5[%c0_12, %c0_13] : memref<1x96xf32, #tpu.memory_space<vmem>>, vector<1x96xf32>
      %14 = vector.broadcast %13 : vector<1x96xf32> to vector<16x96xf32>
      %15 = arith.addf %12, %14 : vector<16x96xf32>
      %c0_14 = arith.constant 0 : index
      %c0_15 = arith.constant 0 : index
      %16 = vector.load %arg6[%c0_14, %c0_15] : memref<16x96xf32, #tpu.memory_space<vmem>>, vector<16x96xf32>
      tpu.vector_store %arg6[%c0_14, %c0_15], %15 {strides = array<i32>} : memref<16x96xf32, #tpu.memory_space<vmem>>, vector<16x96xf32>,
    } else {
    }
    return
  }
  func.func @transform_0(%arg0: i32, %arg1: i32, %arg2: i32) -> (i32, i32) {
    %c0_i32 = arith.constant 0 : i32
    return %arg0, %arg2 : i32, i32
  }
  func.func @transform_1(%arg0: i32, %arg1: i32, %arg2: i32) -> (i32, i32) {
    %c0_i32 = arith.constant 0 : i32
    return %arg2, %arg1 : i32, i32
  }
  func.func @transform_2(%arg0: i32, %arg1: i32, %arg2: i32) -> (i32, i32) {
    %c0_i32 = arith.constant 0 : i32
    %c0_i32_0 = arith.constant 0 : i32
    return %c0_i32, %arg1 : i32, i32
  }
  func.func @transform_3(%arg0: i32, %arg1: i32, %arg2: i32) -> (i32, i32) {
    %c0_i32 = arith.constant 0 : i32
    return %arg0, %arg1 : i32, i32
  }
}

</mosaic_0001>

<bundles_post_ra>
// kernel: tpu_custom_call.1
= control target key start
LH: loop header
LB: loop body
LE: loop exit
PB: predicated region body
PF: predicated region fallthrough
CT: control target
= control target key end

     0   :  { %8 = vsyncpa [#allocation4], 0  ;;  %s274_s0 = inlined_call_operand.hbm [shape: f32[16,32], index: 0, kind: input, shape index: {}]   ;;  %s275_s1 = inlined_call_operand.hbm [shape: f32[32,96], index: 1, kind: input, shape index: {}]   ;;  %s276_s2 = inlined_call_operand.vmem [shape: f32[1,96], index: 2, kind: input, shape index: {}]   ;;  %s277_s3 = inlined_call_operand.hbm [shape: f32[16,96], index: 3, kind: output, shape index: {}]  }
   0x1   :  { %9 = vsyncpa [#allocation7], 0 }
   0x2   :  { %10 = vsyncpa [#allocation5], 0  ;;  %s15_s14 = sshll.u32 %s274_s0, 4  ;;  %s221_s15 = smov [#allocation3]   ;;  %s16_s14 = int_to_ptr.hbm [resolvable:$true] %s15_s14 }
   0x3   :  { %s17_s16 = sshll.u32 %s221_s15, 4  ;;  %s28_s19 = sshll.u32 %s275_s1, 4  ;;  %s18_s16 = int_to_ptr.vmem [resolvable:$true] %s17_s16  ;;  %s29_s19 = int_to_ptr.hbm [resolvable:$true] %s28_s19 }
   0x4   :  { %s222_s20 = smov 128   ;;  %s223_s21 = smov 8  }
   0x5   :  { %23 = dma.hbm_to_vmem [thread:$0]  %s16_s14, 256, %s18_s16, [#allocation4], %s222_s20, %s222_s20, %s223_s21  }
   0x6   :  { %s224_s22 = smov [#allocation6]  }
   0x7   :  { %s30_s23 = sshll.u32 %s224_s22, 4  ;;  %s31_s23 = int_to_ptr.vmem [resolvable:$true] %s30_s23 }
   0x8   :  { %36 = dma.hbm_to_vmem [thread:$0]  %s29_s19, 512, %s31_s23, [#allocation7], %s222_s20, %s222_s20, %s223_s21  }
   0x9   :  { %215 = dma.done.wait [#allocation4], 256  }
   0xa   :  { %216 = vsyncadd [#allocation4], 4294967040 }
   0xb   :  { %217 = dma.done.wait [#allocation7], 512  }
   0xc   :  { %218 = vsyncadd [#allocation7], 4294966784  ;;  %vm51_vm0 = vcmask 785408   ;;  %v225_v0 = vmov 0.0   ;;  %v61_v1 = vld [vmem:[#allocation6 + $0x18] sm:$0xff]  ;;  %v60_v2 = vld [vmem:[#allocation6 + $0x10] sm:$0xff] }
   0xd   :  { %52 = vst.msk [vmem:[#allocation2] sm:$0xff] %vm51_vm0, %v225_v0  ;;  %81 = vmatpush.msra.mxu0 %v61_v1  ;;  %132 = vmatpush.msra.mxu1 %v61_v1  ;;  %v59_v3 = vld [vmem:[#allocation6 + $0x8] sm:$0xff]  ;;  %v58_v4 = vld [vmem:[#allocation6] sm:$0xff]  ;;  %v56_v5 = vld [vmem:[#allocation3] sm:$0xff]  ;;  %vm62_vm1 = vcmask 261120   ;;  %s226_s24 = smov [#allocation8]  }
   0xe   :  { %53 = vst.msk [vmem:[#allocation2 + $0x8] sm:$0xff] %vm51_vm0, %v225_v0  ;;  %v57_v6 = vld [vmem:[#allocation3 + $0x8] sm:$0xff]  ;;  %v142_v13 = vld [vmem:[%s276_s2] ss:$0 sm:$0xff]  ;;  %s114_s25 = sshll.u32 %s226_s24, 4  ;;  %s116_s28 = sshll.u32 %s277_s3, 4  ;;  %s115_s25 = int_to_ptr.vmem [resolvable:$true] %s114_s25  ;;  %s117_s28 = int_to_ptr.hbm [resolvable:$true] %s116_s28 }
   0xf   :  { %82 = vmatpush.msra.mxu0 %v60_v2  ;;  %133 = vmatpush.msra.mxu1 %v60_v2 }
  0x11   :  { %83 = vmatpush.msra.mxu0 %v59_v3  ;;  %134 = vmatpush.msra.mxu1 %v59_v3 }
  0x13   :  { %84 = vmatpush.msra.mxu0 %v58_v4  ;;  %135 = vmatpush.msra.mxu1 %v58_v4 }
  0x14   :  { %130 = vmatmul.msk.f32.vlgmr.msra.gmra.mxu0 %vm62_vm1, %v56_v5  ;;  %131 = vmatmul.msk.f32.vlgmr.msra.gmra.mxu1 %vm62_vm1, %v57_v6  ;;  %v54_v7 = vld [vmem:[#allocation2] sm:$0xff] }
  0x15   :  { %v55_v8 = vld [vmem:[#allocation2 + $0x8] sm:$0xff] }
  0x91   :  { %v86_v9 = vpop.f32.mrf.mxu0  ;;  %v89_v10 = vpop.f32.mrf.mxu1 }
  0x92   :  { %v92_v11 = vadd.f32 %v86_v9, %v54_v7  ;;  %v93_v12 = vadd.f32 %v89_v10, %v55_v8 }
  0x94   :  { %95 = vst.msk [vmem:[#allocation2] sm:$0xff] %vm51_vm0, %v92_v11 }
  0x95   :  { %96 = vst.msk [vmem:[#allocation2 + $0x8] sm:$0xff] %vm51_vm0, %v93_v12 }
  0x9b   :  { %v100_v14 = vld [vmem:[#allocation2] sm:$0xff] }
  0x9c   :  { %v101_v15 = vld [vmem:[#allocation2 + $0x8] sm:$0xff]  ;;  %v106_v16 = vadd.f32 %v142_v13, %v100_v14 }
  0x9d   :  { %v107_v17 = vadd.f32 %v142_v13, %v101_v15 }
  0x9e   :  { %108 = vst.msk [vmem:[#allocation8] sm:$0xff] %vm51_vm0, %v106_v16 }
  0x9f   :  { %109 = vst.msk [vmem:[#allocation8 + $0x8] sm:$0xff] %vm51_vm0, %v107_v17 }
  0xa0   :  { %122 = dma.vmem_to_hbm [thread:$0]  %s115_s25, 256, %s117_s28, [#allocation5], %s222_s20, %s222_s20, %s223_s21  }
  0xa1   :  { %219 = dma.done.wait [#allocation5], 256  }
  0xa2   :  { %220 = vsyncadd [#allocation5], 4294967040 }
  0xa3   :  { %127 = vsyncpa [#allocation4], 1 }
  0xa4   :  { %128 = vsyncpa [#allocation7], 1 }
  0xa5   :  { %129 = vsyncpa [#allocation5], 1 }

</bundles_post_ra>
